<compile_context>
chip_gen: v5e
topology: v5e:2x2
jax: 0.10.0
libtpu: 0.0.40
codegen_flags: <defaults>
</compile_context>

<pallas_src>
import jax
import jax.numpy as jnp
from jax.experimental import pallas as pl
from jax.experimental.pallas import tpu as pltpu


# ----------------------------- Pallas kernel -------------------------------
def _lve_kernel(x_ref, wm_ref, bm_ref, wv_ref, bv_ref, mean_ref, var_ref):
    x = x_ref[...]                                   # (bm, D)

    # mean branch: one MXU matmul + whole-tile bias add, stored directly.
    mean_ref[...] = (
        jnp.dot(x, wm_ref[...], preferred_element_type=jnp.float32) + bm_ref[...]
    )

    # var branch: one MXU matmul + bias, then softplus over the full tile
    # (2 EUP pushes: exp + log1p), scaled by 0.01.
    v_lin = jnp.dot(x, wv_ref[...], preferred_element_type=jnp.float32) + bv_ref[...]
    softplus = jnp.maximum(v_lin, 0.0) + jnp.log1p(jnp.exp(-jnp.abs(v_lin)))
    var_ref[...] = softplus * 0.01


# ------------------------------ wrapper ------------------------------------
def latent_variable_encoder_forward(x, params, *, bm=8):
    """x: (B, D) float32. Returns (mean, var), each (B, O), matching the module."""
    B, D = x.shape
    O = params["w_mean_t"].shape[1]
    bm = min(bm, B)
    grid = (pl.cdiv(B, bm),)

    out = pl.pallas_call(
        _lve_kernel,
        out_shape=(
            jax.ShapeDtypeStruct((B, O), jnp.float32),
            jax.ShapeDtypeStruct((B, O), jnp.float32),
        ),
        grid=grid,
        in_specs=[
            pl.BlockSpec((bm, D), lambda i: (i, 0)),   # x tile streams over batch
            pl.BlockSpec((D, O), lambda i: (0, 0)),    # mean weight (resident)
            pl.BlockSpec((1, O), lambda i: (0, 0)),    # mean bias
            pl.BlockSpec((D, O), lambda i: (0, 0)),    # var weight (resident)
            pl.BlockSpec((1, O), lambda i: (0, 0)),    # var bias
        ],
        out_specs=(
            pl.BlockSpec((bm, O), lambda i: (i, 0)),
            pl.BlockSpec((bm, O), lambda i: (i, 0)),
        ),
        compiler_params=pltpu.CompilerParams(dimension_semantics=("parallel",)),
    )(x, params["w_mean_t"], params["b_mean"], params["w_var_t"], params["b_var"])
    return out


# -------------------------- pure-JAX reference ------------------------------
def latent_variable_encoder_ref(x, raw):
    mean = x @ raw["w_mean"].T + raw["b_mean"]
    v_lin = x @ raw["w_var"].T + raw["b_var"]
    var = jax.nn.softplus(v_lin) * 0.01
    return mean, var


# -------------------------------- main --------------------------------------
if __name__ == "__main__":
    B, D, O = 16, 64, 32  # batch, input_size, output_size

    key = jax.random.PRNGKey(0)
    ks = jax.random.split(key, 5)
    bound = 1.0 / float(jnp.sqrt(D))

    def u(k, shape):
        return jax.random.uniform(k, shape, jnp.float32, -bound, bound)

    # PyTorch nn.Linear parameter shapes: weight (O, D), bias (O,).
    raw = dict(
        w_mean=u(ks[0], (O, D)), b_mean=u(ks[1], (O,)),
        w_var=u(ks[2], (O, D)), b_var=u(ks[3], (O,)),
    )
    x = jax.random.normal(ks[4], (B, D), jnp.float32)

    # Kernel-friendly layout: transposed weights, 2-D biases.
    params = dict(
        w_mean_t=raw["w_mean"].T, b_mean=raw["b_mean"][None, :],
        w_var_t=raw["w_var"].T, b_var=raw["b_var"][None, :],
    )

    mean, var = latent_variable_encoder_forward(x, params)
    mean, var = jax.block_until_ready((mean, var))

    ref_mean, ref_var = latent_variable_encoder_ref(x, raw)
    assert mean.shape == (B, O) and var.shape == (B, O), (mean.shape, var.shape)
    assert jnp.allclose(mean, ref_mean, atol=1e-5, rtol=1e-5), float(
        jnp.max(jnp.abs(mean - ref_mean)))
    assert jnp.allclose(var, ref_var, atol=1e-6, rtol=1e-5), float(
        jnp.max(jnp.abs(var - ref_var)))

    # TODO(synk): LatentVariableEncoder.sample() (torch.normal draw) is not part of
    # forward() and is left to the host/JAX RNG rather than the kernel.

    print("KERNEL_OK")
</pallas_src>

<mosaic_0001>
module attributes {stable_mosaic.version = 11 : i64} {
  func.func @_lve_kernel(%arg0: i32, %arg1: memref<8x64xf32, #tpu.memory_space<vmem>>, %arg2: memref<64x32xf32, #tpu.memory_space<vmem>>, %arg3: memref<1x32xf32, #tpu.memory_space<vmem>>, %arg4: memref<64x32xf32, #tpu.memory_space<vmem>>, %arg5: memref<1x32xf32, #tpu.memory_space<vmem>>, %arg6: memref<8x32xf32, #tpu.memory_space<vmem>>, %arg7: memref<8x32xf32, #tpu.memory_space<vmem>>) attributes {dimension_semantics = [#tpu.dimension_semantics<parallel>], iteration_bounds = array<i64: 2>, scalar_prefetch = 0 : i64, scratch_operands = 0 : i64, tpu.core_type = #tpu.core_type<tc>, window_params = [{transform_indices = @transform_0, window_bounds = array<i64: 8, 64>}, {pipeline_mode = #tpu.pipeline_mode<synchronous>, transform_indices = @transform_1, window_bounds = array<i64: 64, 32>}, {pipeline_mode = #tpu.pipeline_mode<synchronous>, transform_indices = @transform_2, window_bounds = array<i64: 1, 32>}, {pipeline_mode = #tpu.pipeline_mode<synchronous>, transform_indices = @transform_3, window_bounds = array<i64: 64, 32>}, {pipeline_mode = #tpu.pipeline_mode<synchronous>, transform_indices = @transform_4, window_bounds = array<i64: 1, 32>}, {transform_indices = @transform_5, window_bounds = array<i64: 8, 32>}, {transform_indices = @transform_6, window_bounds = array<i64: 8, 32>}]} {
    %c0 = arith.constant 0 : index
    %c0_0 = arith.constant 0 : index
    %0 = vector.load %arg1[%c0, %c0_0] : memref<8x64xf32, #tpu.memory_space<vmem>>, vector<8x64xf32>
    %c0_1 = arith.constant 0 : index
    %c0_2 = arith.constant 0 : index
    %1 = vector.load %arg2[%c0_1, %c0_2] : memref<64x32xf32, #tpu.memory_space<vmem>>, vector<64x32xf32>
    %cst = arith.constant dense<0.000000e+00> : vector<8x32xf32>
    %2 = tpu.matmul %0, %1, %cst {dimension_numbers = #tpu.dot_dimension_numbers<[1], [0], [0], [1], [0, 0, 1, 1], [], []>} : vector<8x64xf32>, vector<64x32xf32>, vector<8x32xf32> -> vector<8x32xf32>
    %c0_3 = arith.constant 0 : index
    %c0_4 = arith.constant 0 : index
    %3 = vector.load %arg3[%c0_3, %c0_4] : memref<1x32xf32, #tpu.memory_space<vmem>>, vector<1x32xf32>
    %4 = vector.broadcast %3 : vector<1x32xf32> to vector<8x32xf32>
    %5 = arith.addf %2, %4 : vector<8x32xf32>
    %c0_5 = arith.constant 0 : index
    %c0_6 = arith.constant 0 : index
    %6 = vector.load %arg6[%c0_5, %c0_6] : memref<8x32xf32, #tpu.memory_space<vmem>>, vector<8x32xf32>
    tpu.vector_store %arg6[%c0_5, %c0_6], %5 {strides = array<i32>} : memref<8x32xf32, #tpu.memory_space<vmem>>, vector<8x32xf32>,
    %c0_7 = arith.constant 0 : index
    %c0_8 = arith.constant 0 : index
    %7 = vector.load %arg4[%c0_7, %c0_8] : memref<64x32xf32, #tpu.memory_space<vmem>>, vector<64x32xf32>
    %cst_9 = arith.constant dense<0.000000e+00> : vector<8x32xf32>
    %8 = tpu.matmul %0, %7, %cst_9 {dimension_numbers = #tpu.dot_dimension_numbers<[1], [0], [0], [1], [0, 0, 1, 1], [], []>} : vector<8x64xf32>, vector<64x32xf32>, vector<8x32xf32> -> vector<8x32xf32>
    %c0_10 = arith.constant 0 : index
    %c0_11 = arith.constant 0 : index
    %9 = vector.load %arg5[%c0_10, %c0_11] : memref<1x32xf32, #tpu.memory_space<vmem>>, vector<1x32xf32>
    %10 = vector.broadcast %9 : vector<1x32xf32> to vector<8x32xf32>
    %11 = arith.addf %8, %10 : vector<8x32xf32>
    %cst_12 = arith.constant 0.000000e+00 : f32
    %12 = vector.broadcast %cst_12 : f32 to vector<8x32xf32>
    %13 = arith.maximumf %11, %12 : vector<8x32xf32>
    %14 = math.absf %11 : vector<8x32xf32>
    %cst_13 = arith.constant 0.000000e+00 : f32
    %15 = vector.broadcast %cst_13 : f32 to vector<8x32xf32>
    %16 = arith.subf %15, %14 : vector<8x32xf32>
    %17 = math.exp %16 : vector<8x32xf32>
    %18 = math.log1p %17 : vector<8x32xf32>
    %19 = arith.addf %13, %18 : vector<8x32xf32>
    %cst_14 = arith.constant 0.00999999977 : f32
    %20 = vector.broadcast %cst_14 : f32 to vector<8x32xf32>
    %21 = arith.mulf %19, %20 : vector<8x32xf32>
    %c0_15 = arith.constant 0 : index
    %c0_16 = arith.constant 0 : index
    %22 = vector.load %arg7[%c0_15, %c0_16] : memref<8x32xf32, #tpu.memory_space<vmem>>, vector<8x32xf32>
    tpu.vector_store %arg7[%c0_15, %c0_16], %21 {strides = array<i32>} : memref<8x32xf32, #tpu.memory_space<vmem>>, vector<8x32xf32>,
    return
  }
  func.func @transform_0(%arg0: i32) -> (i32, i32) {
    %c0_i32 = arith.constant 0 : i32
    %c0_i32_0 = arith.constant 0 : i32
    return %arg0, %c0_i32 : i32, i32
  }
  func.func @transform_1(%arg0: i32) -> (i32, i32) {
    %c0_i32 = arith.constant 0 : i32
    %c0_i32_0 = arith.constant 0 : i32
    %c0_i32_1 = arith.constant 0 : i32
    return %c0_i32, %c0_i32_0 : i32, i32
  }
  func.func @transform_2(%arg0: i32) -> (i32, i32) {
    %c0_i32 = arith.constant 0 : i32
    %c0_i32_0 = arith.constant 0 : i32
    %c0_i32_1 = arith.constant 0 : i32
    return %c0_i32, %c0_i32_0 : i32, i32
  }
  func.func @transform_3(%arg0: i32) -> (i32, i32) {
    %c0_i32 = arith.constant 0 : i32
    %c0_i32_0 = arith.constant 0 : i32
    %c0_i32_1 = arith.constant 0 : i32
    return %c0_i32, %c0_i32_0 : i32, i32
  }
  func.func @transform_4(%arg0: i32) -> (i32, i32) {
    %c0_i32 = arith.constant 0 : i32
    %c0_i32_0 = arith.constant 0 : i32
    %c0_i32_1 = arith.constant 0 : i32
    return %c0_i32, %c0_i32_0 : i32, i32
  }
  func.func @transform_5(%arg0: i32) -> (i32, i32) {
    %c0_i32 = arith.constant 0 : i32
    %c0_i32_0 = arith.constant 0 : i32
    return %arg0, %c0_i32 : i32, i32
  }
  func.func @transform_6(%arg0: i32) -> (i32, i32) {
    %c0_i32 = arith.constant 0 : i32
    %c0_i32_0 = arith.constant 0 : i32
    return %arg0, %c0_i32 : i32, i32
  }
}

</mosaic_0001>

<bundles_post_ra>
// kernel: tpu_custom_call.1
= control target key start
LH: loop header
LB: loop body
LE: loop exit
PB: predicated region body
PF: predicated region fallthrough
CT: control target
= control target key end

     0   :  { %12 = vsyncpa [#allocation3], 0  ;;  %s836_s0 = inlined_call_operand.vmem [shape: f32[16,64], index: 0, kind: input, shape index: {}]   ;;  %s837_s1 = inlined_call_operand.vmem [shape: f32[64,32], index: 1, kind: input, shape index: {}]   ;;  %s838_s2 = inlined_call_operand.vmem [shape: f32[1,32], index: 2, kind: input, shape index: {}]   ;;  %s839_s3 = inlined_call_operand.vmem [shape: f32[64,32], index: 3, kind: input, shape index: {}]   ;;  %s840_s4 = inlined_call_operand.vmem [shape: f32[1,32], index: 4, kind: input, shape index: {}]   ;;  %s841_s5 = inlined_call_operand.hbm [shape: f32[16,32], index: 5, kind: output, shape index: {0}]   ;;  %s842_s6 = inlined_call_operand.hbm [shape: f32[16,32], index: 6, kind: output, shape index: {1}]  }
   0x1   :  { %14 = vsyncpa [#allocation3 + $0x1], 0 }
   0x2   :  { %15 = vsyncpa [#allocation5], 0 }
   0x3   :  { %17 = vsyncpa [#allocation5 + $0x1], 0  ;;  %s669_s21 = smov 0   ;;  %s671_s22 = smov 0  }
   0x4   :  { %s673_s23 = smov 0   ;;  %s675_s24 = smov 0  }
   0x5 LB: > { %s690_s25 = sadd.s32 4294967295, %s632_s24   ;;  %s473_s26 = sadd.s32 4294967294, %s632_s24   ;;  %s632_s24 = sphi %s675_s24, %s848_s24   ;;  %s628_s23 = sphi %s673_s23, %s847_s23   ;;  %s624_s22 = sphi %s671_s22, %s846_s22   ;;  %s620_s21 = sphi %s669_s21, %s845_s21  }
   0x6   : > { %s694_s27 = sadd.s32 1, %s632_s24   ;;  %s140_s28 = sadd.s32 1, %s628_s23 }
   0x7   : > { %s137_s29 = ssub.s32 %s632_s24, %s694_s27  ;;  %p150_p0 = scmp.ne.s32.totalorder %s628_s23, %s624_s22 }
   0x8   : > { %p138_p1 = scmp.eq.s32.totalorder %s137_s29, 0  ;;  %p151_p2 = scmp.eq.s32.totalorder %s690_s25, 1 }
   0x9   : > { %p156_p3 = scmp.ne.s32.totalorder %s624_s22, %s620_s21  ;;  %p157_p4 = scmp.eq.s32.totalorder %s473_s26, 1 }
   0xa   : > { %s705_s30 = scalar_select %p138_p1, %s628_s23, %s140_s28  }
   0xb   : > { %p707_p5 = por %p151_p2, %p150_p0  ;;  %p711_p6 = por %p157_p4, %p156_p3 }
   0xc   : > { %p476_p7 = scmp.ge.s32.totalorder %s632_s24, 1  ;;  %p220_p8 = scmp.lt.s32.totalorder %s632_s24, 3 }
   0xe   : > { %p221_p9 = pnand %p476_p7, %p220_p8 }
   0xf   : > { %p254_p10 = scmp.lt.s32.totalorder (!%p221_p9), %s690_s25, 1  ;;  %s771_s16 = sand.u32 (!%p221_p9), 1, %s624_s22  }
  0x10   : > { %224 = sbr.rel (%p221_p9) target bundleno = 197 (0xc5), region = 40  ;;  %s477_s18 = sshll.u32 (!%p221_p9), %s771_s16, 3 }
  0x11   : > { %s484_s19 = sshll.u32 (!%p221_p9), %s690_s25, 3  ;;  %s246_s11 = scalar_lea.vmem (!%p221_p9), [#allocation2], %s477_s18 }
  0x12   : > { %s364_s12 = sshll.u32 (!%p221_p9), %s246_s11, 4  ;;  %s365_s12 = int_to_ptr.vmem [resolvable:$true] %s364_s12 }
  0x15   : > { %v304_v0 = vld [vmem:[%s839_s3 + $0x38] sm:$0xff]  ;;  %v303_v1 = vld [vmem:[%s839_s3 + $0x30] sm:$0xff]  ;;  %v302_v2 = vld [vmem:[%s839_s3 + $0x28] sm:$0xff]  ;;  %s255_s17 = scalar_select %p254_p10, %s690_s25, 1  ;;  %vm271_vm0 = vcmask 523264   ;;  %vm295_vm1 = vcmask 261120  }
  0x16   : > { %317 = vmatpush.msra.mxu1 %v304_v0  ;;  %v266_v3 = vld [vmem:[%s837_s1 + $0x38] sm:$0xff]  ;;  %v265_v4 = vld [vmem:[%s837_s1 + $0x30] sm:$0xff]  ;;  %v301_v5 = vld [vmem:[%s839_s3 + $0x20] sm:$0xff] }
  0x17   : > { %283 = vmatpush.msra.mxu0 %v266_v3  ;;  %v264_v6 = vld [vmem:[%s837_s1 + $0x28] sm:$0xff]  ;;  %v300_v7 = vld [vmem:[%s839_s3 + $0x18] sm:$0xff]  ;;  %v263_v8 = vld [vmem:[%s837_s1 + $0x20] sm:$0xff]  ;;  %s479_s13 = sshll.u32 %s255_s17, 3  ;;  %s362_s17 = scalar_lea.hbm %s841_s5, %s484_s19 }
  0x18   : > { %318 = vmatpush.msra.mxu1 %v303_v1  ;;  %v299_v9 = vld [vmem:[%s839_s3 + $0x10] sm:$0xff]  ;;  %v262_v10 = vld [vmem:[%s837_s1 + $0x18] sm:$0xff]  ;;  %v298_v11 = vld [vmem:[%s839_s3 + $0x8] sm:$0xff]  ;;  %s257_s29 = scalar_lea.vmem %s836_s0, %s479_s13  ;;  %s366_s14 = sshll.u32 %s362_s17, 4  ;;  %s367_s14 = int_to_ptr.hbm [resolvable:$true] %s366_s14 }
  0x19   : > { %284 = vmatpush.msra.mxu0 %v265_v4  ;;  %v261_v12 = vld [vmem:[%s837_s1 + $0x10] sm:$0xff]  ;;  %v297_v13 = vld [vmem:[%s839_s3] sm:$0xff]  ;;  %v260_v14 = vld [vmem:[%s837_s1 + $0x8] sm:$0xff]  ;;  %s347_s13 = scalar_lea.sflag [#allocation3], %s771_s16  ;;  %s552_s15 = sshra.s32 %s367_s14, 4  ;;  %s553_s15 = int_to_ptr.hbm [resolvable:$true] %s552_s15 }
  0x1a   : > { %319 = vmatpush.msra.mxu1 %v302_v2  ;;  %v258_v15 = vld [vmem:[%s257_s29] sm:$0xff]  ;;  %s554_s20 = scalar_lea.hbm %s553_s15, 8  ;;  %s558_s29 = scalar_lea.hbm %s841_s5, 16 }
  0x1b   : > { %285 = vmatpush.msra.mxu0 %v264_v6  ;;  %v259_v16 = vld [vmem:[%s837_s1] sm:$0xff]  ;;  %p555_p11 = scmp.ne.s32.totalorder %s553_s15, %s554_s20  ;;  %p559_p0 = scmp.lt.s32.totalorder %s553_s15, %s841_s5 }
  0x1c   : > { %320 = vmatpush.msra.mxu1 %v301_v5  ;;  %v532_v17 = vld [vmem:[%s840_s4] ss:$0 sm:$0xff]  ;;  %p560_p1 = scmp.lt.s32.totalorder %s558_s29, %s554_s20 }
  0x1d   : > { %286 = vmatpush.msra.mxu0 %v263_v8  ;;  %v533_v18 = vld [vmem:[%s838_s2] ss:$0 sm:$0xff]  ;;  %p556_p12 = pnand %p555_p11, %p707_p5 }
  0x1e   : > { %321 = vmatpush.msra.mxu1 %v300_v7  ;;  %p561_p2 = por %p560_p1, %p559_p0 }
  0x1f   : > { %287 = vmatpush.msra.mxu0 %v262_v10  ;;  %p557_p13 = pneg %p556_p12 }
  0x20   : > { %322 = vmatpush.msra.mxu1 %v299_v9 }
  0x21   : > { %288 = vmatpush.msra.mxu0 %v261_v12  ;;  %p562_p3 = pnand %p561_p2, %p557_p13 }
  0x22   : > { %323 = vmatpush.msra.mxu1 %v298_v11 }
  0x23   : > { %289 = vmatpush.msra.mxu0 %v260_v14 }
  0x24   : > { %324 = vmatpush.msra.mxu1 %v297_v13 }
  0x25   : > { %481 = vmatmul.msk.f32.vlgmr.msra.gmra.mxu1 %vm271_vm0, %v258_v15  ;;  %290 = vmatpush.msra.mxu0 %v259_v16 }
  0x26   : > { %480 = vmatmul.msk.f32.vlgmr.msra.gmra.mxu0 %vm271_vm0, %v258_v15 }
  0xa2   : > { %v326_v19 = vpop.f32.mrf.mxu1 }
  0xa3   : > { %v327_v20 = vadd.f32 %v532_v17, %v326_v19  ;;  %v292_v21 = vpop.f32.mrf.mxu0 }
  0xa4   : > { %v293_v23 = vadd.f32 %v533_v18, %v292_v21 }
  0xa5   : > { %v330_v22 = vand.u32 2147483647, %v327_v20 }
  0xa6   : > { %296 = vst.msk [vmem:[%s246_s11] sm:$0xff] %vm295_vm1, %v293_v23 }
  0xa7   : > { %v331_v24 = vsub.f32 0.0, %v330_v22 }
  0xa8   : > { %565 = shalt.err (!%p562_p3)
}
  0xa9   : > { %488 = dma.vmem_to_hbm [thread:$0]  (%p707_p5), %s365_s12, 128, %s367_s14, %s347_s13   ;;  %v332_v25 = vmul.f32 1.442695, %v331_v24  ;;  %v329_v34 = vmax.f32 %v327_v20, 0.0 }
  0xaa   : > { %s376_s15 = scalar_lea.hbm %s842_s6, %s484_s19  ;;  %s253_s12 = scalar_lea.vmem [#allocation4], %s477_s18 }
  0xab   : > { %534 = vpow2.f32 %v332_v25  ;;  %s378_s14 = sshll.u32 %s253_s12, 4  ;;  %s380_s13 = sshll.u32 %s376_s15, 4  ;;  %s379_s14 = int_to_ptr.vmem [resolvable:$true] %s378_s14  ;;  %s381_s13 = int_to_ptr.hbm [resolvable:$true] %s380_s13 }
  0xac   : > { %s352_s25 = scalar_lea.sflag [#allocation5], %s771_s16  ;;  %s580_s20 = sshra.s32 %s381_s13, 4  ;;  %s581_s20 = int_to_ptr.hbm [resolvable:$true] %s580_s20 }
  0xad   : > { %s582_s19 = scalar_lea.hbm %s581_s20, 8  ;;  %s586_s18 = scalar_lea.hbm %s842_s6, 16 }
  0xae   : > { %p583_p4 = scmp.ne.s32.totalorder %s581_s20, %s582_s19  ;;  %p587_p9 = scmp.lt.s32.totalorder %s581_s20, %s842_s6 }
  0xaf   : > { %p588_p10 = scmp.lt.s32.totalorder %s586_s18, %s582_s19 }
  0xb0   : > { %p584_p7 = pnand %p583_p4, %p707_p5 }
  0xb1   : > { %v535_v26 = vpop.eup %534  ;;  %p589_p11 = por %p588_p10, %p587_p9 }
  0xb2   : > { %v334_v27 = vadd.f32 1.0, %v535_v26  ;;  %v337_v28 = vmul.f32 -0.5, %v535_v26  ;;  %v340_v30 = vand.u32 2147483647, %v535_v26  ;;  %p585_p8 = pneg %p584_p7 }
  0xb4   : > { %536 = vlog2.f32 %v334_v27  ;;  %v338_v29 = vadd.f32 1.0, %v337_v28  ;;  %vm341_vm2 = vcmp.lt.f32.partialorder %v340_v30, 0.0004427343  ;;  %p590_p12 = pnand %p589_p11, %p585_p8 }
  0xb6   : > { %v339_v33 = vmul.f32 %v535_v26, %v338_v29 }
  0xba   : > { %v537_v31 = vpop.eup %536 }
  0xbb   : > { %v336_v32 = vmul.f32 0.6931472, %v537_v31 }
  0xbd   : > { %v342_v35 = vsel %vm341_vm2, %v339_v33, %v336_v32 }
  0xbe   : > { %v343_v36 = vadd.f32 %v342_v35, %v329_v34 }
  0xc0   : > { %v344_v37 = vmul.f32 0.01, %v343_v36 }
  0xc2   : > { %345 = vst.msk [vmem:[%s253_s12] sm:$0xff] %vm295_vm1, %v344_v37 }
  0xc3   : > { %593 = shalt.err (!%p590_p12)
}
  0xc4   : > { %489 = dma.vmem_to_hbm [thread:$0]  (%p707_p5), %s379_s14, 128, %s381_s13, %s352_s25  }
  0xc5 PF: > { %p499_p13 = scmp.ge.s32.totalorder %s632_s24, 2  ;;  %s392_s16 = sand.u32 1, %s620_s21  }
  0xc6   : > { %s393_s9 = scalar_lea.sflag [#allocation3], %s392_s16 }
  0xc7   : > { %p493_p0 = pnand %p499_p13, %p711_p6 }
  0xc9   : > { %p494_p1 = pneg %p493_p0 }
  0xcb   : > { %611 = dma.done.wait (%p494_p1), %s393_s9, 128  }
  0xcc   : > { %613 = vsyncadd (%p494_p1), %s393_s9, 4294967168  ;;  %s403_s10 = scalar_lea.sflag [#allocation5], %s392_s16 }
  0xcd   : > { %615 = dma.done.wait (%p494_p1), %s403_s10, 128  }
  0xce   : > { %617 = vsyncadd (%p494_p1), %s403_s10, 4294967168  ;;  %p20_p5 = scmp.ge.s32.totalorder %s694_s27, 4   ;;  %s845_s21 = smov %s624_s22 }
  0xcf   : > { %s846_s22 = smov %s628_s23  ;;  %s847_s23 = smov %s705_s30 }
  0xd0   : > { %s848_s24 = smov %s694_s27  ;;  %22 = sbr.rel (!%p20_p5) target bundleno = 5 (0x5), region = 92 }
  0xd5   :  { %409 = vsyncpa [#allocation3], 1 }
  0xd6   :  { %411 = vsyncpa [#allocation3 + $0x1], 1 }
  0xd7   :  { %412 = vsyncpa [#allocation5], 1 }
  0xd8   :  { %414 = vsyncpa [#allocation5 + $0x1], 1 }

</bundles_post_ra>
